<compile_context>
chip_gen: v7x
topology: tpu7x:2x2x1
jax: 0.10.0
libtpu: 0.0.40
codegen_flags: <defaults>
</compile_context>

<pallas_src>
import jax
import jax.numpy as jnp
from jax import lax
from jax.experimental import pallas as pl
from jax.experimental.pallas import tpu as pltpu

EPS = 1e-5


def _cnn_layernorm_kernel(x_ref, g_ref, b_ref, o_ref):
    # x_ref: (bc_tile, F, t_tile)  — time on lanes, n_feats on sublanes.
    # g_ref/b_ref: (F, 1)          — broadcast along lanes.
    x = x_ref[...].astype(jnp.float32)
    mean = jnp.mean(x, axis=1, keepdims=True)                    # reduce over n_feats
    centered = x - mean
    var = jnp.mean(centered * centered, axis=1, keepdims=True)   # biased, like torch
    inv = lax.rsqrt(var + EPS)
    g = g_ref[...].astype(jnp.float32)[None, :, :]               # (1, F, 1)
    b = b_ref[...].astype(jnp.float32)[None, :, :]
    o_ref[...] = (centered * inv * g + b).astype(o_ref.dtype)


def _pick_bc_tile(bc, n_feats, t_tile, itemsize, target_bytes=1 << 20):
    """Largest divisor of bc whose block stays under ~1 MiB."""
    best = 1
    for d in range(1, bc + 1):
        if bc % d == 0 and d * n_feats * t_tile * itemsize <= target_bytes:
            best = d
    return best


def cnn_layer_norm(x, gamma, beta, *, tile_t=512):
    """x: (B, C, n_feats, T) NCHW-style; layer-norm over n_feats."""
    B, C, F, T = x.shape
    bc = B * C
    x3 = x.reshape(bc, F, T)

    lane = 128
    # Lane-dense time tile: multiple of 128, capped at tile_t, no bigger than
    # needed to cover T.
    t_tile = min(int(tile_t), pl.cdiv(T, lane) * lane)
    t_pad = pl.cdiv(T, t_tile) * t_tile
    if t_pad != T:
        x3 = jnp.pad(x3, ((0, 0), (0, 0), (0, t_pad - T)))

    bc_tile = _pick_bc_tile(bc, F, t_tile, x.dtype.itemsize)

    g2 = gamma.reshape(F, 1)
    b2 = beta.reshape(F, 1)

    grid = (bc // bc_tile, t_pad // t_tile)
    y3 = pl.pallas_call(
        _cnn_layernorm_kernel,
        out_shape=jax.ShapeDtypeStruct((bc, F, t_pad), x.dtype),
        grid_spec=pltpu.PrefetchScalarGridSpec(
            num_scalar_prefetch=0,
            grid=grid,
            in_specs=[
                pl.BlockSpec((bc_tile, F, t_tile), lambda i, j: (i, 0, j)),
                pl.BlockSpec((F, 1), lambda i, j: (0, 0)),
                pl.BlockSpec((F, 1), lambda i, j: (0, 0)),
            ],
            out_specs=pl.BlockSpec((bc_tile, F, t_tile), lambda i, j: (i, 0, j)),
        ),
        compiler_params=pltpu.CompilerParams(
            dimension_semantics=("parallel", "parallel")),
    )(x3, g2, b2)

    if t_pad != T:
        y3 = y3[:, :, :T]
    return y3.reshape(B, C, F, T)


def _reference(x, gamma, beta):
    xt = jnp.transpose(x, (0, 1, 3, 2)).astype(jnp.float32)
    mean = jnp.mean(xt, axis=-1, keepdims=True)
    var = jnp.mean((xt - mean) ** 2, axis=-1, keepdims=True)
    y = (xt - mean) / jnp.sqrt(var + EPS) * gamma.astype(jnp.float32) + beta.astype(jnp.float32)
    return jnp.transpose(y, (0, 1, 3, 2)).astype(x.dtype)


if __name__ == "__main__":
    key = jax.random.PRNGKey(0)

    # Primary check: module-consistent small shape (batch, channel, n_feats, time).
    B, C, F, T = 2, 4, 16, 16
    x = jax.random.normal(key, (B, C, F, T), dtype=jnp.float32)
    # nn.LayerNorm(n_feats) default init: weight = ones, bias = zeros
    gamma = jnp.ones((F,), dtype=jnp.float32)
    beta = jnp.zeros((F,), dtype=jnp.float32)

    out = cnn_layer_norm(x, gamma, beta)
    out = jax.block_until_ready(out)
    ref = _reference(x, gamma, beta)
    assert out.shape == (B, C, F, T)
    assert jnp.max(jnp.abs(out - ref)) < 1e-5

    # Secondary check: ragged time length (exercises the padded-tail path)
    # and non-trivial affine params.
    key2, key3, key4 = jax.random.split(jax.random.PRNGKey(1), 3)
    B2, C2, F2, T2 = 1, 3, 32, 20
    x2 = jax.random.normal(key2, (B2, C2, F2, T2), dtype=jnp.float32)
    gamma2 = jax.random.normal(key3, (F2,), dtype=jnp.float32)
    beta2 = jax.random.normal(key4, (F2,), dtype=jnp.float32)
    out2 = jax.block_until_ready(cnn_layer_norm(x2, gamma2, beta2))
    ref2 = _reference(x2, gamma2, beta2)
    assert out2.shape == (B2, C2, F2, T2)
    assert jnp.max(jnp.abs(out2 - ref2)) < 1e-4

    print("KERNEL_OK")
</pallas_src>

<mosaic_0001>
module attributes {stable_mosaic.version = 11 : i64} {
  func.func @_cnn_layernorm_kernel(%arg0: i32, %arg1: i32, %arg2: memref<8x16x128xf32, #tpu.memory_space<vmem>>, %arg3: memref<16x1xf32, #tpu.memory_space<vmem>>, %arg4: memref<16x1xf32, #tpu.memory_space<vmem>>, %arg5: memref<8x16x128xf32, #tpu.memory_space<vmem>>) attributes {dimension_semantics = [#tpu.dimension_semantics<parallel>, #tpu.dimension_semantics<parallel>], iteration_bounds = array<i64: 1, 1>, scalar_prefetch = 0 : i64, scratch_operands = 0 : i64, tpu.core_type = #tpu.core_type<tc>, window_params = [{transform_indices = @transform_0, window_bounds = array<i64: 8, 16, 128>}, {pipeline_mode = #tpu.pipeline_mode<synchronous>, transform_indices = @transform_1, window_bounds = array<i64: 16, 1>}, {pipeline_mode = #tpu.pipeline_mode<synchronous>, transform_indices = @transform_2, window_bounds = array<i64: 16, 1>}, {transform_indices = @transform_3, window_bounds = array<i64: 8, 16, 128>}]} {
    %c0 = arith.constant 0 : index
    %c0_0 = arith.constant 0 : index
    %c0_1 = arith.constant 0 : index
    %0 = vector.load %arg2[%c0, %c0_0, %c0_1] : memref<8x16x128xf32, #tpu.memory_space<vmem>>, vector<8x16x128xf32>
    %cst = arith.constant dense<0.000000e+00> : vector<8x128xf32>
    %1 = vector.multi_reduction <add>, %0, %cst [1] : vector<8x16x128xf32> to vector<8x128xf32>
    %2 = vector.shape_cast %1 : vector<8x128xf32> to vector<8x1x128xf32>
    %cst_2 = arith.constant 1.600000e+01 : f32
    %3 = vector.broadcast %cst_2 : f32 to vector<8x1x128xf32>
    %4 = arith.divf %2, %3 : vector<8x1x128xf32>
    %5 = vector.broadcast %4 : vector<8x1x128xf32> to vector<8x16x128xf32>
    %6 = arith.subf %0, %5 : vector<8x16x128xf32>
    %7 = arith.mulf %6, %6 : vector<8x16x128xf32>
    %cst_3 = arith.constant dense<0.000000e+00> : vector<8x128xf32>
    %8 = vector.multi_reduction <add>, %7, %cst_3 [1] : vector<8x16x128xf32> to vector<8x128xf32>
    %9 = vector.shape_cast %8 : vector<8x128xf32> to vector<8x1x128xf32>
    %cst_4 = arith.constant 1.600000e+01 : f32
    %10 = vector.broadcast %cst_4 : f32 to vector<8x1x128xf32>
    %11 = arith.divf %9, %10 : vector<8x1x128xf32>
    %cst_5 = arith.constant 9.99999974E-6 : f32
    %12 = vector.broadcast %cst_5 : f32 to vector<8x1x128xf32>
    %13 = arith.addf %11, %12 : vector<8x1x128xf32>
    %14 = math.rsqrt %13 : vector<8x1x128xf32>
    %c0_6 = arith.constant 0 : index
    %c0_7 = arith.constant 0 : index
    %15 = vector.load %arg3[%c0_6, %c0_7] : memref<16x1xf32, #tpu.memory_space<vmem>>, vector<16x1xf32>
    %16 = vector.shape_cast %15 : vector<16x1xf32> to vector<1x16x1xf32>
    %c0_8 = arith.constant 0 : index
    %c0_9 = arith.constant 0 : index
    %17 = vector.load %arg4[%c0_8, %c0_9] : memref<16x1xf32, #tpu.memory_space<vmem>>, vector<16x1xf32>
    %18 = vector.shape_cast %17 : vector<16x1xf32> to vector<1x16x1xf32>
    %19 = vector.broadcast %14 : vector<8x1x128xf32> to vector<8x16x128xf32>
    %20 = arith.mulf %6, %19 : vector<8x16x128xf32>
    %21 = vector.broadcast %16 : vector<1x16x1xf32> to vector<8x16x128xf32>
    %22 = arith.mulf %20, %21 : vector<8x16x128xf32>
    %23 = vector.broadcast %18 : vector<1x16x1xf32> to vector<8x16x128xf32>
    %24 = arith.addf %22, %23 : vector<8x16x128xf32>
    %c0_10 = arith.constant 0 : index
    %c0_11 = arith.constant 0 : index
    %c0_12 = arith.constant 0 : index
    %25 = vector.load %arg5[%c0_10, %c0_11, %c0_12] : memref<8x16x128xf32, #tpu.memory_space<vmem>>, vector<8x16x128xf32>
    tpu.vector_store %arg5[%c0_10, %c0_11, %c0_12], %24 {strides = array<i32>} : memref<8x16x128xf32, #tpu.memory_space<vmem>>, vector<8x16x128xf32>,
    return
  }
  func.func @transform_0(%arg0: i32, %arg1: i32) -> (i32, i32, i32) {
    %c0_i32 = arith.constant 0 : i32
    %c0_i32_0 = arith.constant 0 : i32
    return %arg0, %c0_i32, %arg1 : i32, i32, i32
  }
  func.func @transform_1(%arg0: i32, %arg1: i32) -> (i32, i32) {
    %c0_i32 = arith.constant 0 : i32
    %c0_i32_0 = arith.constant 0 : i32
    %c0_i32_1 = arith.constant 0 : i32
    return %c0_i32, %c0_i32_0 : i32, i32
  }
  func.func @transform_2(%arg0: i32, %arg1: i32) -> (i32, i32) {
    %c0_i32 = arith.constant 0 : i32
    %c0_i32_0 = arith.constant 0 : i32
    %c0_i32_1 = arith.constant 0 : i32
    return %c0_i32, %c0_i32_0 : i32, i32
  }
  func.func @transform_3(%arg0: i32, %arg1: i32) -> (i32, i32, i32) {
    %c0_i32 = arith.constant 0 : i32
    %c0_i32_0 = arith.constant 0 : i32
    return %arg0, %c0_i32, %arg1 : i32, i32, i32
  }
}

</mosaic_0001>

<bundles_post_ra>
// kernel: tpu_custom_call.1
= control target key start
LH: loop header
LB: loop body
LE: loop exit
PB: predicated region body
PF: predicated region fallthrough
CT: control target
= control target key end

     0   :  { %8 = vsyncpa [#allocation3], 0  ;;  %s609_s0 = inlined_call_operand.hbm [shape: f32[8,16,128], index: 0, kind: input, shape index: {}]   ;;  %s610_s1 = inlined_call_operand.vmem [shape: f32[16,1], index: 1, kind: input, shape index: {}]   ;;  %s611_s2 = inlined_call_operand.vmem [shape: f32[16,1], index: 2, kind: input, shape index: {}]   ;;  %s612_s3 = inlined_call_operand.hbm [shape: f32[8,16,128], index: 3, kind: output, shape index: {}]  }
   0x1   :  { %9 = vsyncpa [#allocation4], 0  ;;  %s398_s12 = smov [#allocation2]   ;;  %s350_s16 = scalar_lea.hbm %s609_s0, 2048 }
   0x2   :  { %s15_s13 = sshll.u32 %s398_s12, 4  ;;  %p351_p0 = scmp.ne.s32.totalorder %s609_s0, %s350_s16  ;;  %s16_s13 = int_to_ptr.vmem [resolvable:$true] %s15_s13 }
   0x3   :  { %p354_p1 = scmp.lt.u32.totalorder %s350_s16, %s609_s0 }
   0x5   :  { %p356_p2 = pnand %p354_p1, %p351_p0 }
   0x7   :  { %359 = shalt.err (!%p356_p2)
}
   0x8   :  { %s360_s21 = scalar_lea.vmem %s16_s13, 2048  ;;  %p365_p4 = scmp.lt.s32.totalorder %s16_s13, %s16_s13 }
   0x9   :  { %p361_p3 = scmp.ne.s32.totalorder %s16_s13, %s360_s21  ;;  %p366_p5 = scmp.lt.s32.totalorder %s360_s21, %s360_s21 }
   0xb   :  { %p367_p6 = por %p366_p5, %p365_p4 }
   0xd   :  { %p368_p7 = pnand %p367_p6, %p361_p3 }
   0xf   :  { %371 = shalt.err (!%p368_p7)
}
  0x10   :  { %s399_s22 = smov 128   ;;  %s400_s23 = smov 8  }
  0x11   :  { %21 = dma.hbm_to_vmem [thread:$0]  %s609_s0, 2048, %s16_s13, [#allocation3], %s399_s22, %s399_s22, %s400_s23  }
  0x12   :  { %394 = dma.done.wait [#allocation3], 2048  }
  0x13   :  { %395 = vsyncadd [#allocation3], 4294965248  ;;  %v401_v0 = vmov 0   ;;  %v224_v1 = vld [vmem:[%s611_s2] sm:$0xff]  ;;  %v225_v3 = vld [vmem:[%s611_s2 + $0x8] sm:$0xff] }
  0x14   :  { %333 = vset.pattern.permute.xlu1 %v401_v0  ;;  %332 = vset.pattern.permute.xlu0 %v401_v0  ;;  %v222_v2 = vld [vmem:[%s610_s1] sm:$0xff]  ;;  %v223_v4 = vld [vmem:[%s610_s1 + $0x8] sm:$0xff]  ;;  %v454_v7 = vld [vmem:[#allocation2 + $0x10] sm:$0xff]  ;;  %s402_s1 = smov [#allocation5]  }
  0x15   :  { %270 = vperm.xlu1 %333, %v224_v1   ;;  %244 = vperm.xlu0 %332, %v222_v2   ;;  %v450_v5 = vld [vmem:[#allocation2] sm:$0xff]  ;;  %v452_v6 = vld [vmem:[#allocation2 + $0x8] sm:$0xff]  ;;  %v456_v8 = vld [vmem:[#allocation2 + $0x18] sm:$0xff]  ;;  %s315_s2 = sshll.u32 %s402_s1, 4  ;;  %s316_s2 = int_to_ptr.vmem [resolvable:$true] %s315_s2 }
  0x16   :  { %v458_v9 = vld [vmem:[#allocation2 + $0x20] sm:$0xff]  ;;  %v460_v10 = vld [vmem:[#allocation2 + $0x28] sm:$0xff]  ;;  %v462_v11 = vld [vmem:[#allocation2 + $0x30] sm:$0xff]  ;;  %v45_v13 = vadd.f32 %v452_v6, %v450_v5  ;;  %v52_v16 = vadd.f32 %v456_v8, %v454_v7  ;;  %s372_s6 = scalar_lea.vmem %s316_s2, 2048  ;;  %p377_p9 = scmp.lt.s32.totalorder %s316_s2, %s316_s2 }
  0x17   :  { %v464_v12 = vld [vmem:[#allocation2 + $0x38] sm:$0xff]  ;;  %v468_v14 = vld [vmem:[#allocation2 + $0x40] sm:$0xff]  ;;  %v470_v15 = vld [vmem:[#allocation2 + $0x48] sm:$0xff]  ;;  %v59_v19 = vadd.f32 %v460_v10, %v458_v9  ;;  %p373_p8 = scmp.ne.s32.totalorder %s316_s2, %s372_s6  ;;  %p378_p10 = scmp.lt.s32.totalorder %s372_s6, %s372_s6 }
  0x18   :  { %v474_v17 = vld [vmem:[#allocation2 + $0x50] sm:$0xff]  ;;  %v476_v18 = vld [vmem:[#allocation2 + $0x58] sm:$0xff]  ;;  %v480_v20 = vld [vmem:[#allocation2 + $0x60] sm:$0xff]  ;;  %v66_v22 = vadd.f32 %v464_v12, %v462_v11  ;;  %v46_v25 = vrot.slane %v45_v13, 4  ;;  %v73_v26 = vadd.f32 %v470_v15, %v468_v14  ;;  %v53_v27 = vrot.slane %v52_v16, 4 }
  0x19   :  { %275 = vperm.xlu1 %333, %v225_v3   ;;  %249 = vperm.xlu0 %332, %v223_v4   ;;  %v482_v21 = vld [vmem:[#allocation2 + $0x68] sm:$0xff]  ;;  %v486_v23 = vld [vmem:[#allocation2 + $0x70] sm:$0xff]  ;;  %v488_v24 = vld [vmem:[#allocation2 + $0x78] sm:$0xff]  ;;  %v80_v28 = vadd.f32 %v476_v18, %v474_v17  ;;  %v60_v29 = vrot.slane %v59_v19, 4  ;;  %p379_p11 = por %p378_p10, %p377_p9 }
  0x1a   :  { %v87_v30 = vadd.f32 %v482_v21, %v480_v20  ;;  %v67_v31 = vrot.slane %v66_v22, 4  ;;  %v94_v32 = vadd.f32 %v488_v24, %v486_v23  ;;  %v47_v33 = vadd.f32 %v46_v25, %v45_v13 }
  0x1b   :  { %v74_v34 = vrot.slane %v73_v26, 4  ;;  %v54_v35 = vadd.f32 %v53_v27, %v52_v16  ;;  %v81_v36 = vrot.slane %v80_v28, 4  ;;  %v61_v37 = vadd.f32 %v60_v29, %v59_v19  ;;  %p380_p12 = pnand %p379_p11, %p373_p8 }
  0x1c   :  { %v88_v38 = vrot.slane %v87_v30, 4  ;;  %v68_v39 = vadd.f32 %v67_v31, %v66_v22  ;;  %v95_v40 = vrot.slane %v94_v32, 4  ;;  %v48_v41 = vrot.slane %v47_v33, 2 }
  0x1d   :  { %v75_v42 = vadd.f32 %v74_v34, %v73_v26  ;;  %v55_v43 = vrot.slane %v54_v35, 2  ;;  %v82_v44 = vadd.f32 %v81_v36, %v80_v28  ;;  %v62_v45 = vrot.slane %v61_v37, 2 }
  0x1e   :  { %v89_v46 = vadd.f32 %v88_v38, %v87_v30  ;;  %v69_v47 = vrot.slane %v68_v39, 2  ;;  %v96_v48 = vadd.f32 %v95_v40, %v94_v32  ;;  %v49_v49 = vadd.f32 %v48_v41, %v47_v33 }
  0x1f   :  { %v76_v50 = vrot.slane %v75_v42, 2  ;;  %v56_v51 = vadd.f32 %v55_v43, %v54_v35  ;;  %v83_v52 = vrot.slane %v82_v44, 2  ;;  %v63_v53 = vadd.f32 %v62_v45, %v61_v37 }
  0x20   :  { %v90_v54 = vrot.slane %v89_v46, 2  ;;  %v70_v55 = vadd.f32 %v69_v47, %v68_v39  ;;  %v97_v56 = vrot.slane %v96_v48, 2  ;;  %v50_v57 = vrot.slane %v49_v49, 1 }
  0x21   :  { %v77_v58 = vadd.f32 %v76_v50, %v75_v42  ;;  %v57_v59 = vrot.slane %v56_v51, 1  ;;  %v84_v60 = vadd.f32 %v83_v52, %v82_v44  ;;  %v64_v61 = vrot.slane %v63_v53, 1 }
  0x22   :  { %v91_v62 = vadd.f32 %v90_v54, %v89_v46  ;;  %v71_v63 = vrot.slane %v70_v55, 1  ;;  %v98_v0 = vadd.f32 %v97_v56, %v96_v48  ;;  %v51_v1 = vadd.f32 %v50_v57, %v49_v49 }
  0x23   :  { %v78_v2 = vrot.slane %v77_v58, 1  ;;  %v58_v3 = vadd.f32 %v57_v59, %v56_v51  ;;  %v85_v4 = vrot.slane %v84_v60, 1  ;;  %v65_v13 = vadd.f32 %v64_v61, %v63_v53 }
  0x24   :  { %v92_v16 = vrot.slane %v91_v62, 1  ;;  %v72_v19 = vadd.f32 %v71_v63, %v70_v55  ;;  %v99_v22 = vrot.slane %v98_v0, 1  ;;  %v102_v26 = vmul.f32 0.0625, %v51_v1 }
  0x25   :  { %v79_v25 = vadd.f32 %v78_v2, %v77_v58  ;;  %v86_v27 = vadd.f32 %v85_v4, %v84_v60  ;;  %v103_v28 = vmul.f32 0.0625, %v58_v3  ;;  %v104_v30 = vmul.f32 0.0625, %v65_v13 }
  0x26   :  { %v93_v29 = vadd.f32 %v92_v16, %v91_v62  ;;  %v100_v31 = vadd.f32 %v99_v22, %v98_v0  ;;  %v105_v32 = vmul.f32 0.0625, %v72_v19  ;;  %v499_v34 = vsub.f32 %v450_v5, %v102_v26 }
  0x27   :  { %v106_v33 = vmul.f32 0.0625, %v79_v25  ;;  %v502_v35 = vsub.f32 %v452_v6, %v102_v26  ;;  %v107_v36 = vmul.f32 0.0625, %v86_v27  ;;  %v505_v37 = vsub.f32 %v454_v7, %v103_v28 }
  0x28   :  { %v508_v38 = vsub.f32 %v456_v8, %v103_v28  ;;  %v108_v39 = vmul.f32 0.0625, %v93_v29  ;;  %v511_v40 = vsub.f32 %v458_v9, %v104_v30  ;;  %v514_v41 = vsub.f32 %v460_v10, %v104_v30 }
  0x29   :  { %v109_v42 = vmul.f32 0.0625, %v100_v31  ;;  %v517_v5 = vsub.f32 %v462_v11, %v105_v32  ;;  %v520_v6 = vsub.f32 %v464_v12, %v105_v32  ;;  %v523_v7 = vsub.f32 %v468_v14, %v106_v33 }
  0x2a   :  { %v526_v8 = vsub.f32 %v470_v15, %v106_v33  ;;  %v126_v9 = vmul.f32 %v499_v34, %v499_v34  ;;  %v127_v10 = vmul.f32 %v502_v35, %v502_v35  ;;  %v533_v43 = vsub.f32 %v474_v17, %v107_v36 }
  0x2b   :  { %v536_v11 = vsub.f32 %v476_v18, %v107_v36  ;;  %v128_v12 = vmul.f32 %v505_v37, %v505_v37  ;;  %v129_v14 = vmul.f32 %v508_v38, %v508_v38  ;;  %v543_v15 = vsub.f32 %v480_v20, %v108_v39 }
  0x2c   :  { %v546_v44 = vsub.f32 %v482_v21, %v108_v39  ;;  %v130_v45 = vmul.f32 %v511_v40, %v511_v40  ;;  %v131_v17 = vmul.f32 %v514_v41, %v514_v41  ;;  %v553_v18 = vsub.f32 %v486_v23, %v109_v42 }
  0x2d   :  { %v556_v46 = vsub.f32 %v488_v24, %v109_v42  ;;  %v132_v47 = vmul.f32 %v517_v5, %v517_v5  ;;  %v133_v20 = vmul.f32 %v520_v6, %v520_v6  ;;  %v134_v21 = vmul.f32 %v523_v7, %v523_v7 }
  0x2e   :  { %v135_v48 = vmul.f32 %v526_v8, %v526_v8  ;;  %v142_v49 = vadd.f32 %v127_v10, %v126_v9  ;;  %v136_v23 = vmul.f32 %v533_v43, %v533_v43  ;;  %v137_v24 = vmul.f32 %v536_v11, %v536_v11 }
  0x2f   :  { %v149_v50 = vadd.f32 %v129_v14, %v128_v12  ;;  %v138_v51 = vmul.f32 %v543_v15, %v543_v15  ;;  %v139_v52 = vmul.f32 %v546_v44, %v546_v44  ;;  %v156_v53 = vadd.f32 %v131_v17, %v130_v45 }
  0x30   :  { %v140_v54 = vmul.f32 %v553_v18, %v553_v18  ;;  %v141_v55 = vmul.f32 %v556_v46, %v556_v46  ;;  %v163_v56 = vadd.f32 %v133_v20, %v132_v47  ;;  %v143_v57 = vrot.slane %v142_v49, 4 }
  0x31   :  { %v170_v58 = vadd.f32 %v135_v48, %v134_v21  ;;  %v150_v59 = vrot.slane %v149_v50, 4  ;;  %v177_v60 = vadd.f32 %v137_v24, %v136_v23  ;;  %v157_v61 = vrot.slane %v156_v53, 4 }
  0x32   :  { %v184_v62 = vadd.f32 %v139_v52, %v138_v51  ;;  %v164_v63 = vrot.slane %v163_v56, 4  ;;  %v191_v0 = vadd.f32 %v141_v55, %v140_v54  ;;  %v144_v1 = vadd.f32 %v143_v57, %v142_v49 }
  0x33   :  { %v171_v2 = vrot.slane %v170_v58, 4  ;;  %v151_v3 = vadd.f32 %v150_v59, %v149_v50  ;;  %v178_v4 = vrot.slane %v177_v60, 4  ;;  %v158_v13 = vadd.f32 %v157_v61, %v156_v53 }
  0x34   :  { %v185_v16 = vrot.slane %v184_v62, 4  ;;  %v165_v19 = vadd.f32 %v164_v63, %v163_v56  ;;  %v192_v22 = vrot.slane %v191_v0, 4  ;;  %v145_v25 = vrot.slane %v144_v1, 2 }
  0x35   :  { %v172_v26 = vadd.f32 %v171_v2, %v170_v58  ;;  %v152_v27 = vrot.slane %v151_v3, 2  ;;  %v179_v28 = vadd.f32 %v178_v4, %v177_v60  ;;  %v159_v29 = vrot.slane %v158_v13, 2 }
  0x36   :  { %v186_v30 = vadd.f32 %v185_v16, %v184_v62  ;;  %v166_v31 = vrot.slane %v165_v19, 2  ;;  %v193_v32 = vadd.f32 %v192_v22, %v191_v0  ;;  %v146_v33 = vadd.f32 %v145_v25, %v144_v1 }
  0x37   :  { %v173_v36 = vrot.slane %v172_v26, 2  ;;  %v153_v39 = vadd.f32 %v152_v27, %v151_v3  ;;  %v180_v42 = vrot.slane %v179_v28, 2  ;;  %v160_v9 = vadd.f32 %v159_v29, %v158_v13 }
  0x38   :  { %v187_v10 = vrot.slane %v186_v30, 2  ;;  %v167_v12 = vadd.f32 %v166_v31, %v165_v19  ;;  %v194_v14 = vrot.slane %v193_v32, 2  ;;  %v147_v45 = vrot.slane %v146_v33, 1 }
  0x39   :  { %v174_v17 = vadd.f32 %v173_v36, %v172_v26  ;;  %v154_v47 = vrot.slane %v153_v39, 1  ;;  %v181_v20 = vadd.f32 %v180_v42, %v179_v28  ;;  %v161_v21 = vrot.slane %v160_v9, 1 }
  0x3a   :  { %v188_v48 = vadd.f32 %v187_v10, %v186_v30  ;;  %v168_v49 = vrot.slane %v167_v12, 1  ;;  %v195_v23 = vadd.f32 %v194_v14, %v193_v32  ;;  %v148_v24 = vadd.f32 %v147_v45, %v146_v33 }
  0x3b   :  { %v175_v50 = vrot.slane %v174_v17, 1  ;;  %v155_v51 = vadd.f32 %v154_v47, %v153_v39  ;;  %v182_v52 = vrot.slane %v181_v20, 1  ;;  %v162_v53 = vadd.f32 %v161_v21, %v160_v9 }
  0x3c   :  { %v189_v54 = vrot.slane %v188_v48, 1  ;;  %v169_v55 = vadd.f32 %v168_v49, %v167_v12  ;;  %v196_v56 = vrot.slane %v195_v23, 1  ;;  %v198_v58 = vmul.f32 0.0625, %v148_v24 }
  0x3d   :  { %v176_v57 = vadd.f32 %v175_v50, %v174_v17  ;;  %v183_v59 = vadd.f32 %v182_v52, %v181_v20  ;;  %v199_v60 = vmul.f32 0.0625, %v155_v51  ;;  %v200_v62 = vmul.f32 0.0625, %v162_v53 }
  0x3e   :  { %v190_v61 = vadd.f32 %v189_v54, %v188_v48  ;;  %v197_v63 = vadd.f32 %v196_v56, %v195_v23  ;;  %v201_v0 = vmul.f32 0.0625, %v169_v55  ;;  %v206_v2 = vadd.f32 1e-05, %v198_v58 }
  0x3f   :  { %v202_v1 = vmul.f32 0.0625, %v176_v57  ;;  %v203_v3 = vmul.f32 0.0625, %v183_v59  ;;  %v207_v4 = vadd.f32 1e-05, %v199_v60  ;;  %v208_v16 = vadd.f32 1e-05, %v200_v62 }
  0x40   :  { %v204_v13 = vmul.f32 0.0625, %v190_v61  ;;  %v205_v19 = vmul.f32 0.0625, %v197_v63  ;;  %v209_v22 = vadd.f32 1e-05, %v201_v0  ;;  %334 = vrsqrt.f32 %v206_v2 }
  0x41   :  { %v210_v25 = vadd.f32 1e-05, %v202_v1  ;;  %v211_v26 = vadd.f32 1e-05, %v203_v3  ;;  %336 = vrsqrt.f32 %v207_v4 }
  0x42   :  { %v212_v27 = vadd.f32 1e-05, %v204_v13  ;;  %338 = vrsqrt.f32 %v208_v16  ;;  %v213_v28 = vadd.f32 1e-05, %v205_v19 }
  0x43   :  { %340 = vrsqrt.f32 %v209_v22 }
  0x44   :  { %342 = vrsqrt.f32 %v210_v25 }
  0x45   :  { %344 = vrsqrt.f32 %v211_v26 }
  0x46   :  { %346 = vrsqrt.f32 %v212_v27 }
  0x47   :  { %348 = vrsqrt.f32 %v213_v28 }
  0x4a   :  { %v335_v29 = vpop.eup %334 }
  0x4b   :  { %v337_v30 = vpop.eup %336  ;;  %v226_v9 = vmul.f32 %v335_v29, %v499_v34  ;;  %v227_v21 = vmul.f32 %v335_v29, %v502_v35 }
  0x4c   :  { %v339_v31 = vpop.eup %338  ;;  %v228_v10 = vmul.f32 %v337_v30, %v505_v37  ;;  %v229_v48 = vmul.f32 %v337_v30, %v508_v38 }
  0x4d   :  { %v341_v32 = vpop.eup %340  ;;  %v230_v12 = vmul.f32 %v339_v31, %v511_v40  ;;  %v231_v34 = vmul.f32 %v339_v31, %v514_v41 }
  0x4e   :  { %v343_v33 = vpop.eup %342  ;;  %v232_v14 = vmul.f32 %v341_v32, %v517_v5  ;;  %v233_v37 = vmul.f32 %v341_v32, %v520_v6 }
  0x4f   :  { %v345_v36 = vpop.eup %344  ;;  %v234_v45 = vmul.f32 %v343_v33, %v523_v7  ;;  %v235_v5 = vmul.f32 %v343_v33, %v526_v8 }
  0x50   :  { %v347_v39 = vpop.eup %346  ;;  %v236_v17 = vmul.f32 %v345_v36, %v533_v43  ;;  %v237_v7 = vmul.f32 %v345_v36, %v536_v11 }
  0x51   :  { %v349_v42 = vpop.eup %348  ;;  %v238_v47 = vmul.f32 %v347_v39, %v543_v15  ;;  %v239_v43 = vmul.f32 %v347_v39, %v546_v44 }
  0x52   :  { %v240_v20 = vmul.f32 %v349_v42, %v553_v18  ;;  %v241_v15 = vmul.f32 %v349_v42, %v556_v46 }
  0x94   :  { %v271_v49 = vpop.permute.xlu1 %270  ;;  %v245_v40 = vpop.permute.xlu0 %244 }
  0x95   :  { %v252_v23 = vmul.f32 %v245_v40, %v226_v9  ;;  %v254_v18 = vmul.f32 %v245_v40, %v228_v10  ;;  %v256_v24 = vmul.f32 %v245_v40, %v230_v12  ;;  %v258_v35 = vmul.f32 %v245_v40, %v232_v14 }
  0x96   :  { %v260_v50 = vmul.f32 %v245_v40, %v234_v45  ;;  %v262_v38 = vmul.f32 %v245_v40, %v236_v17  ;;  %v264_v51 = vmul.f32 %v245_v40, %v238_v47  ;;  %v266_v41 = vmul.f32 %v245_v40, %v240_v20 }
  0x97   :  { %v278_v52 = vadd.f32 %v271_v49, %v252_v23  ;;  %v280_v6 = vadd.f32 %v271_v49, %v254_v18  ;;  %v282_v53 = vadd.f32 %v271_v49, %v256_v24  ;;  %v284_v54 = vadd.f32 %v271_v49, %v258_v35 }
  0x98   :  { %v250_v55 = vpop.permute.xlu0 %249  ;;  %v286_v8 = vadd.f32 %v271_v49, %v260_v50  ;;  %v288_v56 = vadd.f32 %v271_v49, %v262_v38  ;;  %v290_v11 = vadd.f32 %v271_v49, %v264_v51  ;;  %v292_v57 = vadd.f32 %v271_v49, %v266_v41  ;;  %v276_v60 = vpop.permute.xlu1 %275 }
  0x99   :  { %v253_v44 = vmul.f32 %v250_v55, %v227_v21  ;;  %v255_v58 = vmul.f32 %v250_v55, %v229_v48  ;;  %v257_v46 = vmul.f32 %v250_v55, %v231_v34  ;;  %v259_v59 = vmul.f32 %v250_v55, %v233_v37  ;;  %294 = vst [vmem:[#allocation5] sm:$0xff] %v278_v52 }
  0x9a   :  { %296 = vst [vmem:[#allocation5 + $0x10] sm:$0xff] %v280_v6  ;;  %298 = vst [vmem:[#allocation5 + $0x20] sm:$0xff] %v282_v53  ;;  %v261_v61 = vmul.f32 %v250_v55, %v235_v5  ;;  %v263_v62 = vmul.f32 %v250_v55, %v237_v7  ;;  %v265_v63 = vmul.f32 %v250_v55, %v239_v43 }
  0x9b   :  { %300 = vst [vmem:[#allocation5 + $0x30] sm:$0xff] %v284_v54  ;;  %v267_v0 = vmul.f32 %v250_v55, %v241_v15  ;;  %302 = vst [vmem:[#allocation5 + $0x40] sm:$0xff] %v286_v8  ;;  %v279_v1 = vadd.f32 %v276_v60, %v253_v44  ;;  %v281_v2 = vadd.f32 %v276_v60, %v255_v58 }
  0x9c   :  { %304 = vst [vmem:[#allocation5 + $0x50] sm:$0xff] %v288_v56  ;;  %306 = vst [vmem:[#allocation5 + $0x60] sm:$0xff] %v290_v11  ;;  %v283_v3 = vadd.f32 %v276_v60, %v257_v46  ;;  %v285_v4 = vadd.f32 %v276_v60, %v259_v59  ;;  %v287_v13 = vadd.f32 %v276_v60, %v261_v61 }
  0x9d   :  { %308 = vst [vmem:[#allocation5 + $0x70] sm:$0xff] %v292_v57  ;;  %v289_v16 = vadd.f32 %v276_v60, %v263_v62  ;;  %v291_v19 = vadd.f32 %v276_v60, %v265_v63  ;;  %v293_v22 = vadd.f32 %v276_v60, %v267_v0  ;;  %295 = vst [vmem:[#allocation5 + $0x8] sm:$0xff] %v279_v1 }
  0x9e   :  { %297 = vst [vmem:[#allocation5 + $0x18] sm:$0xff] %v281_v2  ;;  %299 = vst [vmem:[#allocation5 + $0x28] sm:$0xff] %v283_v3 }
  0x9f   :  { %301 = vst [vmem:[#allocation5 + $0x38] sm:$0xff] %v285_v4  ;;  %303 = vst [vmem:[#allocation5 + $0x48] sm:$0xff] %v287_v13 }
  0xa0   :  { %305 = vst [vmem:[#allocation5 + $0x58] sm:$0xff] %v289_v16  ;;  %307 = vst [vmem:[#allocation5 + $0x68] sm:$0xff] %v291_v19 }
  0xa1   :  { %309 = vst [vmem:[#allocation5 + $0x78] sm:$0xff] %v293_v22 }
  0xa2   :  { %383 = shalt.err (!%p380_p12)
}
  0xa3   :  { %s384_s9 = scalar_lea.hbm %s612_s3, 2048 }
  0xa4   :  { %p385_p13 = scmp.ne.s32.totalorder %s612_s3, %s384_s9  ;;  %p388_p0 = scmp.lt.u32.totalorder %s384_s9, %s612_s3 }
  0xa6   :  { %p390_p1 = pnand %p388_p0, %p385_p13 }
  0xa8   :  { %393 = shalt.err (!%p390_p1)
}
  0xa9   :  { %321 = dma.vmem_to_hbm [thread:$0]  %s316_s2, 2048, %s612_s3, [#allocation4], %s399_s22, %s399_s22, %s400_s23  }
  0xaa   :  { %396 = dma.done.wait [#allocation4], 2048  }
  0xab   :  { %397 = vsyncadd [#allocation4], 4294965248 }
  0xac   :  { %325 = vsyncpa [#allocation3], 1 }
  0xad   :  { %326 = vsyncpa [#allocation4], 1 }

</bundles_post_ra>
